<compile_context>
chip_gen: v7x
topology: tpu7x:2x2x1
jax: 0.10.0
libtpu: 0.0.40
codegen_flags: <defaults>
</compile_context>

<pallas_src>
import jax
import jax.numpy as jnp
from jax import lax
from jax.experimental import pallas as pl
from jax.experimental.pallas import tpu as pltpu

B, T, I, H = 2, 8, 1, 32   # batch, seq len, input size, hidden size


def rnn_kernel(x_ref, h0_ref, w_ih_ref, w_hh_ref, b_ref, w_out_ref, b_out_ref,
               out_ref, hn_ref):
    Tn, Bn, _ = x_ref.shape          # (T, B, I) time-major input, fully resident in VMEM
    Hn = w_hh_ref.shape[0]

    # Hoisted input projection: since I == 1, x_t @ W_ih^T is an outer product.
    #   pre[t, b, :] = x[t, b, 0] * w_ih_row + (b_ih + b_hh)
    # One VPU broadcast-multiply + add for all T steps (no MXU push on the recurrence path).
    pre = (x_ref[...] * w_ih_ref[...].reshape(1, 1, Hn)
           + b_ref[...].reshape(1, 1, Hn))                       # (T, B, H)

    w_hh = w_hh_ref[...]                                         # (H, H), held across steps
    h = h0_ref[...]                                              # (B, H)

    # Fully-unrolled time recurrence (T is small & static): per step, one MXU matmul
    # + one EUP tanh; independent work across steps stays visible to the LLO scheduler.
    hs = []
    for t in range(Tn):
        h = jnp.tanh(pre[t] + jnp.dot(h, w_hh, preferred_element_type=jnp.float32))
        hs.append(h)

    hn_ref[...] = h                                              # final hidden, written once

    # Deferred, batched output projection (Linear(H, 1)) for all T steps at once:
    #   out[t, b] = sum_k h_t[b, k] * w_out[0, k] + b_out
    h_all = jnp.stack(hs, axis=0)                                # (T, B, H)
    y = jnp.sum(h_all * w_out_ref[...].reshape(1, 1, Hn), axis=-1)   # (T, B), lane reduce
    out_ref[...] = y + b_out_ref[0]                              # scalar bias from SMEM


def rnn_forward(x, h_state, params):
    """x: (B, T, I) float32 (batch_first, like PyTorch), h_state: (1, B, H) or None."""
    w_ih, w_hh, b_ih, b_hh, w_out, b_out = params
    Bn, Tn, In = x.shape
    if h_state is None:
        h_state = jnp.zeros((1, Bn, H), jnp.float32)

    x_tm = jnp.transpose(x, (1, 0, 2))            # (T, B, I) time-major
    h0 = h_state[0]                               # (B, H)
    w_ih_row = w_ih.reshape(1, H)                 # (1, H)   (W_ih is (H, I=1))
    w_hh_t = w_hh.T                               # (H, H)   so h @ w_hh_t == h @ W_hh^T
    b_row = (b_ih + b_hh).reshape(1, H)           # (1, H)   biases pre-folded
    w_out_row = w_out.reshape(1, H)               # (1, H)   (W_out is (1, H))
    b_out_1 = b_out.reshape(1)                    # (1,) scalar for SMEM

    out_tb, h_n = pl.pallas_call(
        rnn_kernel,
        out_shape=(jax.ShapeDtypeStruct((Tn, Bn), jnp.float32),   # lane-oriented out slab
                   jax.ShapeDtypeStruct((Bn, H), jnp.float32)),   # final hidden state
        grid_spec=pltpu.PrefetchScalarGridSpec(
            num_scalar_prefetch=0,
            grid=(1,),                                            # single invocation
            in_specs=[
                pl.BlockSpec((Tn, Bn, In), lambda i: (0, 0, 0)),  # x, all timesteps
                pl.BlockSpec((Bn, H), lambda i: (0, 0)),          # h0
                pl.BlockSpec((1, H), lambda i: (0, 0)),           # W_ih row
                pl.BlockSpec((H, H), lambda i: (0, 0)),           # W_hh^T
                pl.BlockSpec((1, H), lambda i: (0, 0)),           # b_ih + b_hh
                pl.BlockSpec((1, H), lambda i: (0, 0)),           # W_out row
                pl.BlockSpec(memory_space=pltpu.MemorySpace.SMEM),  # b_out scalar
            ],
            out_specs=[
                pl.BlockSpec((Tn, Bn), lambda i: (0, 0)),         # (T, B) outputs
                pl.BlockSpec((Bn, H), lambda i: (0, 0)),          # h_n
            ],
        ),
        input_output_aliases={1: 1},              # h0 (input 1) aliases h_n (output 1)
        compiler_params=pltpu.CompilerParams(
            dimension_semantics=("arbitrary",)),
    )(x_tm, h0, w_ih_row, w_hh_t, b_row, w_out_row, b_out_1)

    outs = jnp.transpose(out_tb)[..., None]       # (B, T, 1), matches torch.stack(outs, dim=1)
    return outs, h_n[None, ...]                   # h_state: (1, B, H)


def rnn_reference(x, h_state, params):
    """Pure-JAX reference matching nn.RNN(tanh) + Linear, for verification."""
    w_ih, w_hh, b_ih, b_hh, w_out, b_out = params
    if h_state is None:
        h_state = jnp.zeros((1, x.shape[0], H), jnp.float32)
    h = h_state[0]

    def step(h, x_t):
        h_new = jnp.tanh(x_t @ w_ih.T + b_ih + h @ w_hh.T + b_hh)
        y = h_new @ w_out.T + b_out
        return h_new, y

    h_n, ys = lax.scan(step, h, jnp.transpose(x, (1, 0, 2)))
    return jnp.transpose(ys, (1, 0, 2)), h_n[None, ...]


def init_params(key):
    # Deterministic synthetic init (PyTorch-style uniform(-1/sqrt(H), 1/sqrt(H))).
    ks = jax.random.split(key, 6)
    bound = 1.0 / jnp.sqrt(jnp.float32(H))
    w_ih = jax.random.uniform(ks[0], (H, I), jnp.float32, -bound, bound)
    w_hh = jax.random.uniform(ks[1], (H, H), jnp.float32, -bound, bound)
    b_ih = jax.random.uniform(ks[2], (H,), jnp.float32, -bound, bound)
    b_hh = jax.random.uniform(ks[3], (H,), jnp.float32, -bound, bound)
    w_out = jax.random.uniform(ks[4], (1, H), jnp.float32, -bound, bound)
    b_out = jax.random.uniform(ks[5], (1,), jnp.float32, -bound, bound)
    return (w_ih, w_hh, b_ih, b_hh, w_out, b_out)


if __name__ == "__main__":
    key = jax.random.PRNGKey(0)
    k_x, k_h, k_p = jax.random.split(key, 3)
    params = init_params(k_p)

    x = jax.random.normal(k_x, (B, T, I), jnp.float32)
    h_state = jax.random.normal(k_h, (1, B, H), jnp.float32)

    outs, h_n = jax.jit(rnn_forward)(x, h_state, params)
    jax.block_until_ready((outs, h_n))

    outs_ref, h_n_ref = rnn_reference(x, h_state, params)
    assert outs.shape == (B, T, 1) and h_n.shape == (1, B, H)
    assert jnp.allclose(outs, outs_ref, atol=1e-5, rtol=1e-5)
    assert jnp.allclose(h_n, h_n_ref, atol=1e-5, rtol=1e-5)

    print("KERNEL_OK")
</pallas_src>

<mosaic_0001>
module attributes {stable_mosaic.version = 11 : i64} {
  func.func @rnn_kernel(%arg0: i32, %arg1: memref<8x2x1xf32, #tpu.memory_space<vmem>>, %arg2: memref<2x32xf32, #tpu.memory_space<vmem>>, %arg3: memref<1x32xf32, #tpu.memory_space<vmem>>, %arg4: memref<32x32xf32, #tpu.memory_space<vmem>>, %arg5: memref<1x32xf32, #tpu.memory_space<vmem>>, %arg6: memref<1x32xf32, #tpu.memory_space<vmem>>, %arg7: memref<1xf32, #tpu.memory_space<smem>>, %arg8: memref<8x2xf32, #tpu.memory_space<vmem>>, %arg9: memref<2x32xf32, #tpu.memory_space<vmem>>) attributes {dimension_semantics = [#tpu.dimension_semantics<arbitrary>], iteration_bounds = array<i64: 1>, scalar_prefetch = 0 : i64, scratch_operands = 0 : i64, tpu.core_type = #tpu.core_type<tc>, window_params = [{pipeline_mode = #tpu.pipeline_mode<synchronous>, transform_indices = @transform_0, window_bounds = array<i64: 8, 2, 1>}, {pipeline_mode = #tpu.pipeline_mode<synchronous>, transform_indices = @transform_1, window_bounds = array<i64: 2, 32>}, {pipeline_mode = #tpu.pipeline_mode<synchronous>, transform_indices = @transform_2, window_bounds = array<i64: 1, 32>}, {pipeline_mode = #tpu.pipeline_mode<synchronous>, transform_indices = @transform_3, window_bounds = array<i64: 32, 32>}, {pipeline_mode = #tpu.pipeline_mode<synchronous>, transform_indices = @transform_4, window_bounds = array<i64: 1, 32>}, {pipeline_mode = #tpu.pipeline_mode<synchronous>, transform_indices = @transform_5, window_bounds = array<i64: 1, 32>}, {transform_indices = @transform_6, window_bounds = array<i64: 1>}, {pipeline_mode = #tpu.pipeline_mode<synchronous>, transform_indices = @transform_7, window_bounds = array<i64: 8, 2>}, {pipeline_mode = #tpu.pipeline_mode<synchronous>, transform_indices = @transform_8, window_bounds = array<i64: 2, 32>}]} {
    %c0 = arith.constant 0 : index
    %c0_0 = arith.constant 0 : index
    %c0_1 = arith.constant 0 : index
    %0 = vector.load %arg1[%c0, %c0_0, %c0_1] : memref<8x2x1xf32, #tpu.memory_space<vmem>>, vector<8x2x1xf32>
    %c0_2 = arith.constant 0 : index
    %c0_3 = arith.constant 0 : index
    %1 = vector.load %arg3[%c0_2, %c0_3] : memref<1x32xf32, #tpu.memory_space<vmem>>, vector<1x32xf32>
    %2 = vector.shape_cast %1 : vector<1x32xf32> to vector<1x1x32xf32>
    %3 = vector.broadcast %0 : vector<8x2x1xf32> to vector<8x2x32xf32>
    %4 = vector.broadcast %2 : vector<1x1x32xf32> to vector<8x2x32xf32>
    %5 = arith.mulf %3, %4 : vector<8x2x32xf32>
    %c0_4 = arith.constant 0 : index
    %c0_5 = arith.constant 0 : index
    %6 = vector.load %arg5[%c0_4, %c0_5] : memref<1x32xf32, #tpu.memory_space<vmem>>, vector<1x32xf32>
    %7 = vector.shape_cast %6 : vector<1x32xf32> to vector<1x1x32xf32>
    %8 = vector.broadcast %7 : vector<1x1x32xf32> to vector<8x2x32xf32>
    %9 = arith.addf %5, %8 : vector<8x2x32xf32>
    %c0_6 = arith.constant 0 : index
    %c0_7 = arith.constant 0 : index
    %10 = vector.load %arg4[%c0_6, %c0_7] : memref<32x32xf32, #tpu.memory_space<vmem>>, vector<32x32xf32>
    %c0_8 = arith.constant 0 : index
    %c0_9 = arith.constant 0 : index
    %11 = vector.load %arg2[%c0_8, %c0_9] : memref<2x32xf32, #tpu.memory_space<vmem>>, vector<2x32xf32>
    %12 = vector.extract_strided_slice %9 {offsets = [0, 0, 0], sizes = [1, 2, 32], strides = [1, 1, 1]} : vector<8x2x32xf32> to vector<1x2x32xf32>
    %13 = vector.shape_cast %12 : vector<1x2x32xf32> to vector<2x32xf32>
    %cst = arith.constant dense<0.000000e+00> : vector<2x32xf32>
    %14 = tpu.matmul %11, %10, %cst {dimension_numbers = #tpu.dot_dimension_numbers<[1], [0], [0], [1], [0, 0, 1, 1], [], []>} : vector<2x32xf32>, vector<32x32xf32>, vector<2x32xf32> -> vector<2x32xf32>
    %15 = arith.addf %13, %14 : vector<2x32xf32>
    %16 = math.tanh %15 : vector<2x32xf32>
    %17 = vector.extract_strided_slice %9 {offsets = [1, 0, 0], sizes = [1, 2, 32], strides = [1, 1, 1]} : vector<8x2x32xf32> to vector<1x2x32xf32>
    %18 = vector.shape_cast %17 : vector<1x2x32xf32> to vector<2x32xf32>
    %cst_10 = arith.constant dense<0.000000e+00> : vector<2x32xf32>
    %19 = tpu.matmul %16, %10, %cst_10 {dimension_numbers = #tpu.dot_dimension_numbers<[1], [0], [0], [1], [0, 0, 1, 1], [], []>} : vector<2x32xf32>, vector<32x32xf32>, vector<2x32xf32> -> vector<2x32xf32>
    %20 = arith.addf %18, %19 : vector<2x32xf32>
    %21 = math.tanh %20 : vector<2x32xf32>
    %22 = vector.extract_strided_slice %9 {offsets = [2, 0, 0], sizes = [1, 2, 32], strides = [1, 1, 1]} : vector<8x2x32xf32> to vector<1x2x32xf32>
    %23 = vector.shape_cast %22 : vector<1x2x32xf32> to vector<2x32xf32>
    %cst_11 = arith.constant dense<0.000000e+00> : vector<2x32xf32>
    %24 = tpu.matmul %21, %10, %cst_11 {dimension_numbers = #tpu.dot_dimension_numbers<[1], [0], [0], [1], [0, 0, 1, 1], [], []>} : vector<2x32xf32>, vector<32x32xf32>, vector<2x32xf32> -> vector<2x32xf32>
    %25 = arith.addf %23, %24 : vector<2x32xf32>
    %26 = math.tanh %25 : vector<2x32xf32>
    %27 = vector.extract_strided_slice %9 {offsets = [3, 0, 0], sizes = [1, 2, 32], strides = [1, 1, 1]} : vector<8x2x32xf32> to vector<1x2x32xf32>
    %28 = vector.shape_cast %27 : vector<1x2x32xf32> to vector<2x32xf32>
    %cst_12 = arith.constant dense<0.000000e+00> : vector<2x32xf32>
    %29 = tpu.matmul %26, %10, %cst_12 {dimension_numbers = #tpu.dot_dimension_numbers<[1], [0], [0], [1], [0, 0, 1, 1], [], []>} : vector<2x32xf32>, vector<32x32xf32>, vector<2x32xf32> -> vector<2x32xf32>
    %30 = arith.addf %28, %29 : vector<2x32xf32>
    %31 = math.tanh %30 : vector<2x32xf32>
    %32 = vector.extract_strided_slice %9 {offsets = [4, 0, 0], sizes = [1, 2, 32], strides = [1, 1, 1]} : vector<8x2x32xf32> to vector<1x2x32xf32>
    %33 = vector.shape_cast %32 : vector<1x2x32xf32> to vector<2x32xf32>
    %cst_13 = arith.constant dense<0.000000e+00> : vector<2x32xf32>
    %34 = tpu.matmul %31, %10, %cst_13 {dimension_numbers = #tpu.dot_dimension_numbers<[1], [0], [0], [1], [0, 0, 1, 1], [], []>} : vector<2x32xf32>, vector<32x32xf32>, vector<2x32xf32> -> vector<2x32xf32>
    %35 = arith.addf %33, %34 : vector<2x32xf32>
    %36 = math.tanh %35 : vector<2x32xf32>
    %37 = vector.extract_strided_slice %9 {offsets = [5, 0, 0], sizes = [1, 2, 32], strides = [1, 1, 1]} : vector<8x2x32xf32> to vector<1x2x32xf32>
    %38 = vector.shape_cast %37 : vector<1x2x32xf32> to vector<2x32xf32>
    %cst_14 = arith.constant dense<0.000000e+00> : vector<2x32xf32>
    %39 = tpu.matmul %36, %10, %cst_14 {dimension_numbers = #tpu.dot_dimension_numbers<[1], [0], [0], [1], [0, 0, 1, 1], [], []>} : vector<2x32xf32>, vector<32x32xf32>, vector<2x32xf32> -> vector<2x32xf32>
    %40 = arith.addf %38, %39 : vector<2x32xf32>
    %41 = math.tanh %40 : vector<2x32xf32>
    %42 = vector.extract_strided_slice %9 {offsets = [6, 0, 0], sizes = [1, 2, 32], strides = [1, 1, 1]} : vector<8x2x32xf32> to vector<1x2x32xf32>
    %43 = vector.shape_cast %42 : vector<1x2x32xf32> to vector<2x32xf32>
    %cst_15 = arith.constant dense<0.000000e+00> : vector<2x32xf32>
    %44 = tpu.matmul %41, %10, %cst_15 {dimension_numbers = #tpu.dot_dimension_numbers<[1], [0], [0], [1], [0, 0, 1, 1], [], []>} : vector<2x32xf32>, vector<32x32xf32>, vector<2x32xf32> -> vector<2x32xf32>
    %45 = arith.addf %43, %44 : vector<2x32xf32>
    %46 = math.tanh %45 : vector<2x32xf32>
    %47 = vector.extract_strided_slice %9 {offsets = [7, 0, 0], sizes = [1, 2, 32], strides = [1, 1, 1]} : vector<8x2x32xf32> to vector<1x2x32xf32>
    %48 = vector.shape_cast %47 : vector<1x2x32xf32> to vector<2x32xf32>
    %cst_16 = arith.constant dense<0.000000e+00> : vector<2x32xf32>
    %49 = tpu.matmul %46, %10, %cst_16 {dimension_numbers = #tpu.dot_dimension_numbers<[1], [0], [0], [1], [0, 0, 1, 1], [], []>} : vector<2x32xf32>, vector<32x32xf32>, vector<2x32xf32> -> vector<2x32xf32>
    %50 = arith.addf %48, %49 : vector<2x32xf32>
    %51 = math.tanh %50 : vector<2x32xf32>
    %c0_17 = arith.constant 0 : index
    %c0_18 = arith.constant 0 : index
    %52 = vector.load %arg9[%c0_17, %c0_18] : memref<2x32xf32, #tpu.memory_space<vmem>>, vector<2x32xf32>
    tpu.vector_store %arg9[%c0_17, %c0_18], %51 {strides = array<i32>} : memref<2x32xf32, #tpu.memory_space<vmem>>, vector<2x32xf32>,
    %53 = vector.shape_cast %16 : vector<2x32xf32> to vector<1x2x32xf32>
    %54 = vector.shape_cast %21 : vector<2x32xf32> to vector<1x2x32xf32>
    %55 = vector.shape_cast %26 : vector<2x32xf32> to vector<1x2x32xf32>
    %56 = vector.shape_cast %31 : vector<2x32xf32> to vector<1x2x32xf32>
    %57 = vector.shape_cast %36 : vector<2x32xf32> to vector<1x2x32xf32>
    %58 = vector.shape_cast %41 : vector<2x32xf32> to vector<1x2x32xf32>
    %59 = vector.shape_cast %46 : vector<2x32xf32> to vector<1x2x32xf32>
    %60 = vector.shape_cast %51 : vector<2x32xf32> to vector<1x2x32xf32>
    %61 = tpu.concatenate %53, %54, %55, %56, %57, %58, %59, %60 in 0 : vector<1x2x32xf32>, vector<1x2x32xf32>, vector<1x2x32xf32>, vector<1x2x32xf32>, vector<1x2x32xf32>, vector<1x2x32xf32>, vector<1x2x32xf32>, vector<1x2x32xf32> -> vector<8x2x32xf32>
    %c0_19 = arith.constant 0 : index
    %c0_20 = arith.constant 0 : index
    %62 = vector.load %arg6[%c0_19, %c0_20] : memref<1x32xf32, #tpu.memory_space<vmem>>, vector<1x32xf32>
    %63 = vector.shape_cast %62 : vector<1x32xf32> to vector<1x1x32xf32>
    %64 = vector.broadcast %63 : vector<1x1x32xf32> to vector<8x2x32xf32>
    %65 = arith.mulf %61, %64 : vector<8x2x32xf32>
    %cst_21 = arith.constant dense<0.000000e+00> : vector<8x2xf32>
    %66 = vector.multi_reduction <add>, %65, %cst_21 [2] : vector<8x2x32xf32> to vector<8x2xf32>
    %c0_22 = arith.constant 0 : index
    %67 = memref.load %arg7[%c0_22] : memref<1xf32, #tpu.memory_space<smem>>
    %68 = vector.broadcast %67 : f32 to vector<8x2xf32>
    %69 = arith.addf %66, %68 : vector<8x2xf32>
    %c0_23 = arith.constant 0 : index
    %c0_24 = arith.constant 0 : index
    %70 = vector.load %arg8[%c0_23, %c0_24] : memref<8x2xf32, #tpu.memory_space<vmem>>, vector<8x2xf32>
    tpu.vector_store %arg8[%c0_23, %c0_24], %69 {strides = array<i32>} : memref<8x2xf32, #tpu.memory_space<vmem>>, vector<8x2xf32>,
    return
  }
  func.func @transform_0(%arg0: i32) -> (i32, i32, i32) {
    %c0_i32 = arith.constant 0 : i32
    %c0_i32_0 = arith.constant 0 : i32
    %c0_i32_1 = arith.constant 0 : i32
    %c0_i32_2 = arith.constant 0 : i32
    return %c0_i32, %c0_i32_0, %c0_i32_1 : i32, i32, i32
  }
  func.func @transform_1(%arg0: i32) -> (i32, i32) {
    %c0_i32 = arith.constant 0 : i32
    %c0_i32_0 = arith.constant 0 : i32
    %c0_i32_1 = arith.constant 0 : i32
    return %c0_i32, %c0_i32_0 : i32, i32
  }
  func.func @transform_2(%arg0: i32) -> (i32, i32) {
    %c0_i32 = arith.constant 0 : i32
    %c0_i32_0 = arith.constant 0 : i32
    %c0_i32_1 = arith.constant 0 : i32
    return %c0_i32, %c0_i32_0 : i32, i32
  }
  func.func @transform_3(%arg0: i32) -> (i32, i32) {
    %c0_i32 = arith.constant 0 : i32
    %c0_i32_0 = arith.constant 0 : i32
    %c0_i32_1 = arith.constant 0 : i32
    return %c0_i32, %c0_i32_0 : i32, i32
  }
  func.func @transform_4(%arg0: i32) -> (i32, i32) {
    %c0_i32 = arith.constant 0 : i32
    %c0_i32_0 = arith.constant 0 : i32
    %c0_i32_1 = arith.constant 0 : i32
    return %c0_i32, %c0_i32_0 : i32, i32
  }
  func.func @transform_5(%arg0: i32) -> (i32, i32) {
    %c0_i32 = arith.constant 0 : i32
    %c0_i32_0 = arith.constant 0 : i32
    %c0_i32_1 = arith.constant 0 : i32
    return %c0_i32, %c0_i32_0 : i32, i32
  }
  func.func @transform_6(%arg0: i32) -> i32 {
    %c0_i32 = arith.constant 0 : i32
    %c0_i32_0 = arith.constant 0 : i32
    return %c0_i32 : i32
  }
  func.func @transform_7(%arg0: i32) -> (i32, i32) {
    %c0_i32 = arith.constant 0 : i32
    %c0_i32_0 = arith.constant 0 : i32
    %c0_i32_1 = arith.constant 0 : i32
    return %c0_i32, %c0_i32_0 : i32, i32
  }
  func.func @transform_8(%arg0: i32) -> (i32, i32) {
    %c0_i32 = arith.constant 0 : i32
    %c0_i32_0 = arith.constant 0 : i32
    %c0_i32_1 = arith.constant 0 : i32
    return %c0_i32, %c0_i32_0 : i32, i32
  }
}

</mosaic_0001>

<bundles_post_ra>
// kernel: rnn_forward.1
= control target key start
LH: loop header
LB: loop body
LE: loop exit
PB: predicated region body
PF: predicated region fallthrough
CT: control target
= control target key end

     0   :  { %v1040_v0 = vmov 0.0|0.0   ;;  %vm1041_vm0 = vmmov 0   ;;  %v1042_v4 = vmov 0.0   ;;  %v1043_v7 = vmov 0   ;;  %s1245_s3 = inlined_call_operand.vmem [shape: f32[32,32], index: 3, kind: input, shape index: {}]   ;;  %s1246_s0 = inlined_call_operand.vmem [shape: f32[8,2,1], index: 0, kind: input, shape index: {}]   ;;  %s1247_s1 = inlined_call_operand.vmem [shape: f32[2,32], index: 1, kind: input, shape index: {}, may-alias: {1,8}]   ;;  %s1248_s2 = inlined_call_operand.vmem [shape: f32[1,32], index: 2, kind: input, shape index: {}]   ;;  %s1249_s4 = inlined_call_operand.vmem [shape: f32[1,32], index: 4, kind: input, shape index: {}]   ;;  %s1250_s5 = inlined_call_operand.vmem [shape: f32[1,32], index: 5, kind: input, shape index: {}]   ;;  %s1251_s8 = inlined_call_operand.vmem [shape: f32[2,32], index: 8, kind: output, shape index: {1}, may-alias: {1,8}]   ;;  %s1252_s6 = inlined_call_operand.<no memory space> [shape: f32[1], index: 6, kind: input, shape index: {}]   ;;  %s1253_s7 = inlined_call_operand.vmem [shape: f32[8,2], index: 7, kind: output, shape index: {0}]  }
   0x1   :  { %970 = vmatprep.subr.bf16.mxu0 %v1040_v0  ;;  %v107_v1 = vld [vmem:[%s1245_s3] sm:$0xff]  ;;  %v108_v2 = vld [vmem:[%s1245_s3 + $0x8] sm:$0xff]  ;;  %v109_v3 = vld [vmem:[%s1245_s3 + $0x10] sm:$0xff]  ;;  %890 = vmatprep.mubr.msk.f32.mxu0 %vm1041_vm0, %v1042_v4  ;;  %vm112_vm1 = vcmask 261120   ;;  %vm713_vm2 = vcmask 254976   ;;  %vm806_vm3 = vcmask 1041409  }
   0x2   :  { %v1101_v5 = vpack.c.bf16 %v108_v2, %v107_v1  ;;  %v110_v6 = vld [vmem:[%s1245_s3 + $0x18] sm:$0xff]  ;;  %1022 = vset.pattern.permute.xlu0 %v1043_v7  ;;  %v29_v8 = vld [vmem:[%s1246_s0] sm:$0x3]  ;;  %976 = vmatprep.subr.bf16.mxu1 %v1040_v0  ;;  %v30_v10 = vld [vmem:[%s1246_s0 + $0x2] sm:$0x3]  ;;  %vm808_vm4 = vcmask 1042434  }
   0x3   :  { %40 = vperm.xlu0 %1022, %v29_v8   ;;  %901 = vmatprep.mubr.msk.f32.mxu1 %vm1041_vm0, %v1042_v4  ;;  %v1113_v9 = vpack.c.bf16 %v110_v6, %v109_v3  ;;  %v111_v11 = vld [vmem:[%s1247_s1] sm:$0x3]  ;;  %v33_v12 = vld [vmem:[%s1246_s0 + $0x8] sm:$0x3]  ;;  %v35_v13 = vld [vmem:[%s1246_s0 + $0xc] sm:$0x3] }
   0x4   :  { %972 = vmatpush3.bf16.msra.mxu0 %v1101_v5  ;;  %978 = vmatpush3.bf16.msra.mxu1 %v1101_v5  ;;  %v1144_v14 = vld [vmem:[%s1248_s2] ss:$0 sm:$0xff]  ;;  %v31_v26 = vld [vmem:[%s1246_s0 + $0x4] sm:$0x3]  ;;  %v32_v27 = vld [vmem:[%s1246_s0 + $0x6] sm:$0x3] }
   0x5   :  { %973 = vmatprep.subr.bf16.mxu0 %v1040_v0  ;;  %979 = vmatprep.subr.bf16.mxu1 %v1040_v0  ;;  %v1150_v17 = vld [vmem:[%s1249_s4] ss:$0 sm:$0xff]  ;;  %v34_v28 = vld [vmem:[%s1246_s0 + $0xa] sm:$0x3]  ;;  %v36_v29 = vld [vmem:[%s1246_s0 + $0xe] sm:$0x3] }
   0x6   :  { %1023 = vset.pattern.permute.xlu1 %v1043_v7  ;;  %v1156_v22 = vld [vmem:[%s1250_s5] ss:$0 sm:$0xff]  ;;  %vm810_vm5 = vcmask 1043459   ;;  %vm812_vm6 = vcmask 1044484   ;;  %vm814_vm7 = vcmask 1045509   ;;  %vm816_vm8 = vcmask 1046534  }
   0x7   :  { %45 = vperm.xlu0 %1022, %v30_v10   ;;  %50 = vperm.xlu1 %1023, %v31_v26   ;;  %vm818_vm9 = vcmask 1047559   ;;  %vm821_vm10 = vcmask 15360  }
   0x8   :  { %975 = vmatpush3.bf16.msra.mxu0 %v1113_v9  ;;  %981 = vmatpush3.bf16.msra.mxu1 %v1113_v9 }
   0x9   :  { %982 = vmatprep.subr.bf16.mxu0 %v1040_v0  ;;  %988 = vmatprep.subr.bf16.mxu1 %v1040_v0 }
   0xb   :  { %891 = vmatmul.mubr.msk.f32.vlgmr.msra.gmra.mrb[0].mxu0 %vm112_vm1, %v111_v11  ;;  %60 = vperm.xlu0 %1022, %v33_v12  }
   0xc   :  { %984 = vmatpush3.bf16.msra.mxu0 %v1101_v5  ;;  %912 = vmatprep.mubr.msk.f32.mxu0 %vm1041_vm0, %v1042_v4 }
   0xd   :  { %985 = vmatprep.subr.bf16.mxu0 %v1040_v0  ;;  %55 = vperm.xlu1 %1023, %v32_v27  }
   0xf   :  { %70 = vperm.xlu0 %1022, %v35_v13  }
  0x10   :  { %987 = vmatpush3.bf16.msra.mxu0 %v1113_v9 }
  0x11   :  { %994 = vmatprep.subr.bf16.mxu0 %v1040_v0  ;;  %65 = vperm.xlu1 %1023, %v34_v28  }
  0x15   :  { %75 = vperm.xlu1 %1023, %v36_v29  }
  0x82   :  { %v41_v15 = vpop.permute.xlu0 %40 }
  0x83   :  { %v84_v16 = vmul.f32 %v1144_v14, %v41_v15 }
  0x85   :  { %v99_v18 = vadd.f32 %v1150_v17, %v84_v16 }
  0x86   :  { %v46_v30 = vpop.permute.xlu0 %45  ;;  %v51_v39 = vpop.permute.xlu1 %50 }
  0x87   :  { %v85_v31 = vmul.f32 %v1144_v14, %v46_v30  ;;  %v86_v40 = vmul.f32 %v1144_v14, %v51_v39 }
  0x89   :  { %v100_v32 = vadd.f32 %v1150_v17, %v85_v31  ;;  %v101_v41 = vadd.f32 %v1150_v17, %v86_v40 }
  0x8a   :  { %v61_v57 = vpop.permute.xlu0 %60 }
  0x8b   :  { %v88_v58 = vmul.f32 %v1144_v14, %v61_v57 }
  0x8c   :  { %v56_v48 = vpop.permute.xlu1 %55 }
  0x8d   :  { %v87_v49 = vmul.f32 %v1144_v14, %v56_v48  ;;  %v103_v59 = vadd.f32 %v1150_v17, %v88_v58 }
  0x8f   :  { %v102_v50 = vadd.f32 %v1150_v17, %v87_v49 }
  0x90   :  { %v66_v3 = vpop.permute.xlu1 %65 }
  0x91   :  { %v89_v6 = vmul.f32 %v1144_v14, %v66_v3 }
  0x93   :  { %v104_v7 = vadd.f32 %v1150_v17, %v89_v6 }
  0xde   :  { %v182_v19 = vpop.f32.mrb[0].mxu0 }
  0xdf   :  { %v186_v20 = vadd.f32 %v182_v19, %v99_v18  ;;  %v892_v21 = vpop.f32.mrb[1].mxu0 }
  0xe1   :  { %1024 = vtanh.f32 %v186_v20 }
  0xeb   :  { %v1025_v23 = vpop.eup %1024 }
  0xec   :  { %902 = vmatmul.mubr.msk.f32.vlgmr.msra.gmra.mrb[0].mxu1 %vm112_vm1, %v1025_v23  ;;  %v722_v24 = vmul.f32 %v1025_v23, %v1156_v22  ;;  %v76_v23 = vpop.permute.xlu1 %75 }
  0xed   :  { %990 = vmatpush3.bf16.msra.mxu1 %v1101_v5  ;;  %923 = vmatprep.mubr.msk.f32.mxu1 %vm1041_vm0, %v1042_v4 }
  0xee   :  { %v730_v25 = vsel %vm713_vm2, %v722_v24, 0.0  ;;  %991 = vmatprep.subr.bf16.mxu1 %v1040_v0  ;;  %v91_v24 = vmul.f32 %v1144_v14, %v76_v23 }
  0xef   :  { %731 = vadd.xlane.f32.xlu0 %v730_v25 }
  0xf0   :  { %v106_v25 = vadd.f32 %v1150_v17, %v91_v24 }
  0xf1   :  { %993 = vmatpush3.bf16.msra.mxu1 %v1113_v9 }
  0xf2   :  { %1000 = vmatprep.subr.bf16.mxu1 %v1040_v0 }
 0x1bf   :  { %v257_v33 = vpop.f32.mrb[0].mxu1 }
 0x1c0   :  { %v261_v34 = vadd.f32 %v257_v33, %v100_v32  ;;  %v903_v35 = vpop.f32.mrb[1].mxu1 }
 0x1c2   :  { %1026 = vtanh.f32 %v261_v34 }
 0x1cc   :  { %v1027_v36 = vpop.eup %1026 }
 0x1cd   :  { %913 = vmatmul.mubr.msk.f32.vlgmr.msra.gmra.mrb[2].mxu0 %vm112_vm1, %v1027_v36  ;;  %v723_v37 = vmul.f32 %v1027_v36, %v1156_v22 }
 0x1ce   :  { %996 = vmatpush3.bf16.msra.mxu0 %v1101_v5  ;;  %934 = vmatprep.mubr.msk.f32.mxu0 %vm1041_vm0, %v1042_v4 }
 0x1cf   :  { %v733_v38 = vsel %vm713_vm2, %v723_v37, 0.0  ;;  %997 = vmatprep.subr.bf16.mxu0 %v1040_v0 }
 0x1d0   :  { %734 = vadd.xlane.f32.xlu1 %v733_v38  ;;  %v755_v38 = vstv %s1252_s6 }
 0x1d2   :  { %999 = vmatpush3.bf16.msra.mxu0 %v1113_v9 }
 0x1d3   :  { %1006 = vmatprep.subr.bf16.mxu0 %v1040_v0 }
 0x25d   :  { %v735_v34 = vpop.xlane.xlu1 %734 }
 0x25e   :  { %v757_v39 = vadd.f32 %v755_v38, %v735_v34 }
 0x2a0   :  { %v332_v42 = vpop.f32.mrb[2].mxu0 }
 0x2a1   :  { %v336_v43 = vadd.f32 %v332_v42, %v101_v41  ;;  %v914_v44 = vpop.f32.mrb[3].mxu0 }
 0x2a3   :  { %1028 = vtanh.f32 %v336_v43 }
 0x2ad   :  { %v1029_v45 = vpop.eup %1028 }
 0x2ae   :  { %924 = vmatmul.mubr.msk.f32.vlgmr.msra.gmra.mrb[2].mxu1 %vm112_vm1, %v1029_v45  ;;  %v724_v46 = vmul.f32 %v1029_v45, %v1156_v22 }
 0x2af   :  { %1002 = vmatpush3.bf16.msra.mxu1 %v1101_v5  ;;  %945 = vmatprep.mubr.msk.f32.mxu1 %vm1041_vm0, %v1042_v4 }
 0x2b0   :  { %v736_v47 = vsel %vm713_vm2, %v724_v46, 0.0  ;;  %1003 = vmatprep.subr.bf16.mxu1 %v1040_v0 }
 0x2b1   :  { %737 = vadd.xlane.f32.xlu0 %v736_v47 }
 0x2b3   :  { %1005 = vmatpush3.bf16.msra.mxu1 %v1113_v9 }
 0x2b4   :  { %1012 = vmatprep.subr.bf16.mxu1 %v1040_v0 }
 0x381   :  { %v407_v51 = vpop.f32.mrb[2].mxu1 }
 0x382   :  { %v411_v52 = vadd.f32 %v407_v51, %v102_v50  ;;  %v925_v53 = vpop.f32.mrb[3].mxu1 }
 0x384   :  { %1030 = vtanh.f32 %v411_v52 }
 0x38e   :  { %v1031_v54 = vpop.eup %1030 }
 0x38f   :  { %935 = vmatmul.mubr.msk.f32.vlgmr.msra.gmra.mrb[4].mxu0 %vm112_vm1, %v1031_v54  ;;  %v725_v55 = vmul.f32 %v1031_v54, %v1156_v22 }
 0x390   :  { %1008 = vmatpush3.bf16.msra.mxu0 %v1101_v5  ;;  %956 = vmatprep.mubr.msk.f32.mxu0 %vm1041_vm0, %v1042_v4 }
 0x391   :  { %v739_v56 = vsel %vm713_vm2, %v725_v55, 0.0  ;;  %1009 = vmatprep.subr.bf16.mxu0 %v1040_v0 }
 0x392   :  { %740 = vadd.xlane.f32.xlu0 %v739_v56 }
 0x394   :  { %1011 = vmatpush3.bf16.msra.mxu0 %v1113_v9 }
 0x462   :  { %v482_v60 = vpop.f32.mrb[4].mxu0 }
 0x463   :  { %v486_v61 = vadd.f32 %v482_v60, %v103_v59  ;;  %v936_v62 = vpop.f32.mrb[5].mxu0 }
 0x465   :  { %1032 = vtanh.f32 %v486_v61 }
 0x46f   :  { %v1033_v63 = vpop.eup %1032 }
 0x470   :  { %946 = vmatmul.mubr.msk.f32.vlgmr.msra.gmra.mrb[4].mxu1 %vm112_vm1, %v1033_v63  ;;  %v726_v1 = vmul.f32 %v1033_v63, %v1156_v22 }
 0x471   :  { %1014 = vmatpush3.bf16.msra.mxu1 %v1101_v5  ;;  %967 = vmatprep.mubr.msk.f32.mxu1 %vm1041_vm0, %v1042_v4 }
 0x472   :  { %v742_v2 = vsel %vm713_vm2, %v726_v1, 0.0  ;;  %1015 = vmatprep.subr.bf16.mxu1 %v1040_v0  ;;  %v71_v0 = vpop.permute.xlu0 %70 }
 0x473   :  { %743 = vadd.xlane.f32.xlu1 %v742_v2 }
 0x475   :  { %1017 = vmatpush3.bf16.msra.mxu1 %v1113_v9  ;;  %v90_v9 = vmul.f32 %v1144_v14, %v71_v0  ;;  %v772_v14 = vlaneseq }
 0x476   :  { %v732_v32 = vpop.xlane.xlu0 %731 }
 0x477   :  { %v105_v13 = vadd.f32 %v1150_v17, %v90_v9  ;;  %v773_v35 = vand.u32 127, %v772_v14  ;;  %v775_v36 = vshrl.u32 %v772_v14, 7 }
 0x479   :  { %v776_v42 = vsub.s32 %v773_v35, %v775_v36 }
 0x47a   :  { %v738_v33 = vpop.xlane.xlu0 %737 }
 0x47b   :  { %v758_v40 = vadd.f32 %v755_v38, %v738_v33  ;;  %v781_v46 = vrot.slane %v757_v39, %v776_v42 }
 0x47d   :  { %v785_v48 = vrot.slane %v758_v40, %v776_v42 }
 0x47e   :  { %v741_v17 = vpop.xlane.xlu0 %740 }
 0x47f   :  { %v759_v43 = vadd.f32 %v755_v38, %v741_v17 }
 0x481   :  { %v789_v51 = vrot.slane %v759_v43, %v776_v42 }
 0x500   :  { %v744_v37 = vpop.xlane.xlu1 %743 }
 0x501   :  { %v760_v45 = vadd.f32 %v755_v38, %v744_v37 }
 0x503   :  { %v793_v52 = vrot.slane %v760_v45, %v776_v42 }
 0x543   :  { %v557_v8 = vpop.f32.mrb[4].mxu1 }
 0x544   :  { %v561_v10 = vadd.f32 %v557_v8, %v104_v7  ;;  %v947_v11 = vpop.f32.mrb[5].mxu1 }
 0x546   :  { %1034 = vtanh.f32 %v561_v10 }
 0x550   :  { %v1035_v5 = vpop.eup %1034 }
 0x551   :  { %957 = vmatmul.mubr.msk.f32.vlgmr.msra.gmra.mrb[6].mxu0 %vm112_vm1, %v1035_v5  ;;  %v727_v4 = vmul.f32 %v1035_v5, %v1156_v22 }
 0x553   :  { %v745_v12 = vsel %vm713_vm2, %v727_v4, 0.0 }
 0x554   :  { %746 = vadd.xlane.f32.xlu0 %v745_v12 }
 0x5e1   :  { %v747_v41 = vpop.xlane.xlu0 %746 }
 0x5e2   :  { %v761_v47 = vadd.f32 %v755_v38, %v747_v41 }
 0x5e4   :  { %v797_v54 = vrot.slane %v761_v47, %v776_v42 }
 0x624   :  { %v632_v15 = vpop.f32.mrb[6].mxu0 }
 0x625   :  { %v636_v16 = vadd.f32 %v632_v15, %v105_v13  ;;  %v958_v18 = vpop.f32.mrb[7].mxu0 }
 0x627   :  { %1036 = vtanh.f32 %v636_v16 }
 0x631   :  { %v1037_v19 = vpop.eup %1036 }
 0x632   :  { %968 = vmatmul.mubr.msk.f32.vlgmr.msra.gmra.mrb[6].mxu1 %vm112_vm1, %v1037_v19  ;;  %v728_v20 = vmul.f32 %v1037_v19, %v1156_v22 }
 0x634   :  { %v748_v21 = vsel %vm713_vm2, %v728_v20, 0.0 }
 0x635   :  { %749 = vadd.xlane.f32.xlu1 %v748_v21 }
 0x6c2   :  { %v750_v44 = vpop.xlane.xlu1 %749 }
 0x6c3   :  { %v762_v49 = vadd.f32 %v755_v38, %v750_v44 }
 0x6c5   :  { %v801_v56 = vrot.slane %v762_v49, %v776_v42 }
 0x705   :  { %v707_v26 = vpop.f32.mrb[6].mxu1 }
 0x706   :  { %v711_v27 = vadd.f32 %v707_v26, %v106_v25  ;;  %v969_v28 = vpop.f32.mrb[7].mxu1 }
 0x708   :  { %1038 = vtanh.f32 %v711_v27 }
 0x712   :  { %v1039_v29 = vpop.eup %1038 }
 0x713   :  { %714 = vst.msk [vmem:[%s1251_s8] sm:$0x3] %vm713_vm2, %v1039_v29  ;;  %v729_v30 = vmul.f32 %v1039_v29, %v1156_v22  ;;  %v756_v22 = vadd.f32 %v755_v38, %v732_v32 }
 0x715   :  { %v751_v31 = vsel %vm713_vm2, %v729_v30, 0.0  ;;  %v777_v50 = vrot.slane %v756_v22, %v776_v42 }
 0x716   :  { %752 = vadd.xlane.f32.xlu0 %v751_v31 }
 0x717   :  { %v807_v53 = vsel %vm806_vm3, %v781_v46, %v777_v50 }
 0x718   :  { %v809_v55 = vsel %vm808_vm4, %v785_v48, %v807_v53 }
 0x719   :  { %v811_v58 = vsel %vm810_vm5, %v789_v51, %v809_v55 }
 0x71a   :  { %v813_v60 = vsel %vm812_vm6, %v793_v52, %v811_v58 }
 0x71b   :  { %v815_v61 = vsel %vm814_vm7, %v797_v54, %v813_v60 }
 0x71c   :  { %v817_v63 = vsel %vm816_vm8, %v801_v56, %v815_v61 }
 0x7a3   :  { %v753_v57 = vpop.xlane.xlu0 %752 }
 0x7a4   :  { %v763_v59 = vadd.f32 %v755_v38, %v753_v57 }
 0x7a6   :  { %v805_v62 = vrot.slane %v763_v59, %v776_v42 }
 0x7a8   :  { %v819_v1 = vsel %vm818_vm9, %v805_v62, %v817_v63 }
 0x7a9   :  { %822 = vst.msk [vmem:[%s1253_s7] sm:$0xff] %vm821_vm10, %v819_v1 }

</bundles_post_ra>
